<compile_context>
chip_gen: v7x
topology: tpu7x:2x2x1
jax: 0.10.0
libtpu: 0.0.40
codegen_flags: <defaults>
</compile_context>

<pallas_src>
import functools

import jax
import jax.numpy as jnp
from jax.experimental import pallas as pl
from jax.experimental.pallas import tpu as pltpu


# --------------------------------------------------------------------------------------
# Fused forward kernel (one grid step == one batch element)
# --------------------------------------------------------------------------------------

def _fused_kernel(*refs, n_flat, n_seq, W, C, has_exo):
    it = iter(refs)
    w_ref = next(it)                     # (2,)     sigmoid-normalised net weights (SMEM)
    xp_ref = next(it)                    # (W, P)   past inputs for this batch element
    xf_ref = next(it)                    # (H, F)   future inputs
    ma_ref = next(it)                    # (W, W)   banded moving-average matrix
    flat_first = (next(it), next(it))    # (T, W), (T, 1)
    flat_rest = [(next(it), next(it)) for _ in range(n_flat - 1)]     # (T, T), (T, 1)
    hwf_ref, hbf_ref = next(it), next(it)                             # (C, C), (1, C)
    if has_exo:
        enc_first = (next(it), next(it), next(it))                    # (C, D), (P-C, D), (1, D)
    else:
        enc_first = (next(it), next(it))                              # (C, D), (1, D)
    enc_rest = [(next(it), next(it)) for _ in range(n_seq - 1)]       # (D, D), (1, D)
    dec_cells = [(next(it), next(it), next(it), next(it)) for _ in range(n_seq)]
    hws_ref, hbs_ref = next(it), next(it)                             # (D, Cout), (1, Cout)
    out_ref = next(it)                                                # (H, Cout)

    f32 = jnp.float32
    xp = xp_ref[...]                      # (W, P)
    x_tgt = xp[:, :C]                     # (W, C) target channels

    # ---------------- flat branch (time-major layout, no transposes) ----------------
    # trend = replicate-padded 25-tap moving average == banded matrix @ x_tgt
    trend = jnp.dot(ma_ref[...], x_tgt, preferred_element_type=f32)   # (W, C)

    # embedding = [x_tgt ; zeros(H, C)]; the zero half contributes nothing, so the first
    # flat cell uses only the first W columns of its (transposed) weight.
    wt0_ref, bf0_ref = flat_first
    y = jnp.dot(wt0_ref[...], x_tgt, preferred_element_type=f32) + bf0_ref[...]
    state = jnp.maximum(y, 0.0) if n_flat > 1 else y                  # (T, C)
    for idx, (wt_ref, bf_ref) in enumerate(flat_rest, start=1):
        y = jnp.dot(wt_ref[...], state, preferred_element_type=f32) + bf_ref[...]
        state = jnp.maximum(y, 0.0) if idx != n_flat - 1 else y       # last flat cell linear

    fore_cast = state[W:, :]                                          # (H, C)
    flat_fore = (jnp.dot(fore_cast, hwf_ref[...], preferred_element_type=f32)
                 + hbf_ref[...])                                      # (H, C)

    # ---------------- seq branch (consumes trend-augmented past) ----------------
    # x_past_trend = concat([trend, exogenous]); the first encoder weight is pre-split so
    # no lane-axis concat is needed: trend @ W_a + exo @ W_b.
    if has_exo:
        wa_ref, wb_ref, be_ref = enc_first
        pre = (jnp.dot(trend, wa_ref[...], preferred_element_type=f32)
               + jnp.dot(xp[:, C:], wb_ref[...], preferred_element_type=f32)
               + be_ref[...])
    else:
        wa_ref, be_ref = enc_first
        pre = jnp.dot(trend, wa_ref[...], preferred_element_type=f32) + be_ref[...]
    sstate = jnp.maximum(pre, 0.0)                                    # (W, D)
    pools = [jnp.mean(sstate, axis=0, keepdims=True)]                 # (1, D) per-cell pool
    for we_ref, be_ref in enc_rest:
        sstate = jnp.maximum(
            jnp.dot(sstate, we_ref[...], preferred_element_type=f32) + be_ref[...], 0.0)
        pools.append(jnp.mean(sstate, axis=0, keepdims=True))
    net_pool = pools[-1]                                              # pooled net encoder output

    dstate = xf_ref[...]                                              # (H, F)
    for i, (wx_ref, wec_ref, wnc_ref, bd_ref) in enumerate(dec_cells):
        # concat([x, ctx_e, ctx_n]) @ W  ==  x @ W_x + ctx_e @ W_e + ctx_n @ W_n
        ctx = (jnp.dot(pools[i], wec_ref[...], preferred_element_type=f32)
               + jnp.dot(net_pool, wnc_ref[...], preferred_element_type=f32))   # (1, D)
        dstate = jnp.maximum(
            jnp.dot(dstate, wx_ref[...], preferred_element_type=f32) + ctx + bd_ref[...],
            0.0)                                                      # (H, D)

    seq_fore = (jnp.dot(dstate, hws_ref[...], preferred_element_type=f32)
                + hbs_ref[...])                                       # (H, Cout)

    # ---------------- fused weighted mix epilogue (single masked store) ----------------
    w_seq = w_ref[0]                                                  # SMEM scalars
    w_flat = w_ref[1]
    out = w_seq * seq_fore + w_flat * flat_fore
    out_ref[...] = out.astype(out_ref.dtype)


def _full_spec(shape):
    nd = len(shape)
    return pl.BlockSpec(shape, lambda b, _z=(0,) * nd: _z)


def mixed_concat_forward(params, x_past, x_future):
    """MixedConcatSampledNet.forward == forward_concat_net(flat_net, seq_net, ...)."""
    B, W, P = x_past.shape
    _, H, F = x_future.shape
    C = params['flat_head'][0].shape[0]                  # d_output
    Cout = params['seq_head'][0].shape[1]
    n_flat = len(params['flat_cells'])
    n_seq = len(params['enc_cells'])
    has_exo = len(params['enc_cells'][0]) == 3

    # transform_nets_weights(): sigmoid then normalise to sum 1 (two scalars, stays in XLA)
    w = jax.nn.sigmoid(params['nets_weights'])
    w = (w / jnp.sum(w)).astype(jnp.float32)             # (2,) -> SMEM scalars

    weight_args = [params['ma_matrix']]
    for cell in params['flat_cells']:
        weight_args += list(cell)
    weight_args += list(params['flat_head'])
    for cell in params['enc_cells']:
        weight_args += list(cell)
    for cell in params['dec_cells']:
        weight_args += list(cell)
    weight_args += list(params['seq_head'])

    in_specs = ([pl.BlockSpec(memory_space=pltpu.MemorySpace.SMEM),
                 pl.BlockSpec((None, W, P), lambda b: (b, 0, 0)),
                 pl.BlockSpec((None, H, F), lambda b: (b, 0, 0))]
                + [_full_spec(a.shape) for a in weight_args])

    kernel = functools.partial(_fused_kernel, n_flat=n_flat, n_seq=n_seq,
                               W=W, C=C, has_exo=has_exo)

    return pl.pallas_call(
        kernel,
        grid=(B,),
        in_specs=in_specs,
        out_specs=pl.BlockSpec((None, H, Cout), lambda b: (b, 0, 0)),
        out_shape=jax.ShapeDtypeStruct((B, H, Cout), jnp.float32),
        compiler_params=pltpu.CompilerParams(dimension_semantics=("parallel",)),
    )(w, x_past, x_future, *weight_args)


# --------------------------------------------------------------------------------------
# Parameter construction (kernel-ready layouts)
# --------------------------------------------------------------------------------------

def _moving_avg_matrix(T, k):
    """(T, T) matrix M such that M @ x equals the kernel_size-k moving average of x over
    time with replicate padding of (k-1)//2 on each side (Autoformer series_decomp)."""
    pad = (k - 1) // 2
    t = jnp.arange(T)[:, None]
    j = jnp.arange(k)[None, :]
    src = jnp.clip(t + j - pad, 0, T - 1)                    # (T, k)
    onehot = jax.nn.one_hot(src, T, dtype=jnp.float32)       # (T, k, T)
    return onehot.sum(axis=1) / float(k)


def init_params(key, *, d_input_past, d_input_future, d_output, d_model,
                window_size, forecasting_horizon, n_cells_seq, n_cells_flat,
                nets_weights, ma_kernel_size=25):
    T = window_size + forecasting_horizon
    keys = iter(jax.random.split(key, 2 * n_cells_seq + n_cells_flat + 4))

    def dense(din, dout, scale=0.1):
        kw, kb = jax.random.split(next(keys))
        return (scale * jax.random.normal(kw, (din, dout), jnp.float32),
                scale * jax.random.normal(kb, (dout,), jnp.float32))

    # ---- seq encoder cells: first cell weight is pre-split (trend | exogenous) ----
    enc_cells = []
    we0, be0 = dense(d_input_past, d_model)
    if d_input_past > d_output:
        enc_cells.append((we0[:d_output], we0[d_output:], be0.reshape(1, d_model)))
    else:
        enc_cells.append((we0[:d_output], be0.reshape(1, d_model)))
    for _ in range(n_cells_seq - 1):
        we, be = dense(d_model, d_model)
        enc_cells.append((we, be.reshape(1, d_model)))

    # ---- seq decoder cells: concat weight split into W_x / W_e / W_n ----
    dec_cells, din = [], d_input_future
    for _ in range(n_cells_seq):
        wfull, bd = dense(din + 2 * d_model, d_model)
        dec_cells.append((wfull[:din],
                          wfull[din:din + d_model],
                          wfull[din + d_model:],
                          bd.reshape(1, d_model)))
        din = d_model

    # ---- flat cells: stored transposed so the flat branch runs in (time, channel) layout;
    #      first cell keeps only the past-half columns (future half of embedding is zero) ----
    flat_cells = []
    for i in range(n_cells_flat):
        wf, bf = dense(T, T)
        wt = jnp.transpose(wf)
        if i == 0:
            wt = wt[:, :window_size]
        flat_cells.append((wt, bf.reshape(T, 1)))

    hw_s, hb_s = dense(d_model, d_output)
    hw_f, hb_f = dense(d_output, d_output)

    return dict(
        enc_cells=enc_cells,
        dec_cells=dec_cells,
        flat_cells=flat_cells,
        seq_head=(hw_s, hb_s.reshape(1, d_output)),
        flat_head=(hw_f, hb_f.reshape(1, d_output)),
        ma_matrix=_moving_avg_matrix(window_size, ma_kernel_size),
        nets_weights=jnp.asarray(nets_weights, jnp.float32),
    )


# --------------------------------------------------------------------------------------
# Pure-JAX reference (same math, used only to validate the kernel)
# --------------------------------------------------------------------------------------

def reference_forward(params, x_past, x_future):
    B, W, P = x_past.shape
    H = x_future.shape[1]
    C = params['flat_head'][0].shape[0]
    n_flat = len(params['flat_cells'])

    w = jax.nn.sigmoid(params['nets_weights'])
    w = w / jnp.sum(w)

    x_tgt = x_past[:, :, :C]
    trend = jnp.einsum('ts,bsc->btc', params['ma_matrix'], x_tgt)

    wt0, b0 = params['flat_cells'][0]
    state = jnp.einsum('tu,buc->btc', wt0, x_tgt) + b0[None]
    if n_flat > 1:
        state = jnp.maximum(state, 0.0)
    for i in range(1, n_flat):
        wt, b = params['flat_cells'][i]
        state = jnp.einsum('tu,buc->btc', wt, state) + b[None]
        if i != n_flat - 1:
            state = jnp.maximum(state, 0.0)
    hwf, hbf = params['flat_head']
    flat_fore = state[:, W:, :] @ hwf + hbf

    enc0 = params['enc_cells'][0]
    if len(enc0) == 3:
        wa, wb, be = enc0
        sstate = trend @ wa + x_past[:, :, C:] @ wb + be
    else:
        wa, be = enc0
        sstate = trend @ wa + be
    sstate = jnp.maximum(sstate, 0.0)
    pools = [jnp.mean(sstate, axis=1, keepdims=True)]
    for we, be in params['enc_cells'][1:]:
        sstate = jnp.maximum(sstate @ we + be, 0.0)
        pools.append(jnp.mean(sstate, axis=1, keepdims=True))
    net_pool = pools[-1]

    dstate = x_future
    for i, (wx, wec, wnc, bd) in enumerate(params['dec_cells']):
        ctx = pools[i] @ wec + net_pool @ wnc
        dstate = jnp.maximum(dstate @ wx + ctx + bd, 0.0)
    hws, hbs = params['seq_head']
    seq_fore = dstate @ hws + hbs

    return w[0] * seq_fore + w[1] * flat_fore


# --------------------------------------------------------------------------------------
# Main
# --------------------------------------------------------------------------------------

if __name__ == "__main__":
    B = 2
    window_size = 16
    forecasting_horizon = 8
    d_input_past = 4
    d_input_future = 3
    d_output = 2
    d_model = 32
    n_cells = 2

    key = jax.random.PRNGKey(0)
    k_params, k_past, k_future = jax.random.split(key, 3)

    params = init_params(
        k_params,
        d_input_past=d_input_past, d_input_future=d_input_future,
        d_output=d_output, d_model=d_model,
        window_size=window_size, forecasting_horizon=forecasting_horizon,
        n_cells_seq=n_cells, n_cells_flat=n_cells,
        nets_weights=[0.5, -0.3],
    )

    x_past = jax.random.normal(k_past, (B, window_size, d_input_past), jnp.float32)
    x_future = jax.random.normal(k_future, (B, forecasting_horizon, d_input_future),
                                 jnp.float32)

    fwd = jax.jit(mixed_concat_forward)
    forecast = jax.block_until_ready(fwd(params, x_past, x_future))

    assert forecast.shape == (B, forecasting_horizon, d_output), forecast.shape
    assert forecast.dtype == jnp.float32
    assert bool(jnp.all(jnp.isfinite(forecast)))

    ref = jax.block_until_ready(reference_forward(params, x_past, x_future))
    max_err = float(jnp.max(jnp.abs(forecast - ref)))
    assert jnp.allclose(forecast, ref, atol=1e-2, rtol=1e-2), max_err

    print("KERNEL_OK")
</pallas_src>

<mosaic_0001>
module attributes {stable_mosaic.version = 11 : i64} {
  func.func @_fused_kernel(%arg0: i32, %arg1: memref<2xf32, #tpu.memory_space<smem>>, %arg2: memref<1x16x4xf32, #tpu.memory_space<vmem>>, %arg3: memref<1x8x3xf32, #tpu.memory_space<vmem>>, %arg4: memref<16x16xf32, #tpu.memory_space<vmem>>, %arg5: memref<24x16xf32, #tpu.memory_space<vmem>>, %arg6: memref<24x1xf32, #tpu.memory_space<vmem>>, %arg7: memref<24x24xf32, #tpu.memory_space<vmem>>, %arg8: memref<24x1xf32, #tpu.memory_space<vmem>>, %arg9: memref<2x2xf32, #tpu.memory_space<vmem>>, %arg10: memref<1x2xf32, #tpu.memory_space<vmem>>, %arg11: memref<2x32xf32, #tpu.memory_space<vmem>>, %arg12: memref<2x32xf32, #tpu.memory_space<vmem>>, %arg13: memref<1x32xf32, #tpu.memory_space<vmem>>, %arg14: memref<32x32xf32, #tpu.memory_space<vmem>>, %arg15: memref<1x32xf32, #tpu.memory_space<vmem>>, %arg16: memref<3x32xf32, #tpu.memory_space<vmem>>, %arg17: memref<32x32xf32, #tpu.memory_space<vmem>>, %arg18: memref<32x32xf32, #tpu.memory_space<vmem>>, %arg19: memref<1x32xf32, #tpu.memory_space<vmem>>, %arg20: memref<32x32xf32, #tpu.memory_space<vmem>>, %arg21: memref<32x32xf32, #tpu.memory_space<vmem>>, %arg22: memref<32x32xf32, #tpu.memory_space<vmem>>, %arg23: memref<1x32xf32, #tpu.memory_space<vmem>>, %arg24: memref<32x2xf32, #tpu.memory_space<vmem>>, %arg25: memref<1x2xf32, #tpu.memory_space<vmem>>, %arg26: memref<1x8x2xf32, #tpu.memory_space<vmem>>) attributes {dimension_semantics = [#tpu.dimension_semantics<parallel>], iteration_bounds = array<i64: 2>, scalar_prefetch = 0 : i64, scratch_operands = 0 : i64, tpu.core_type = #tpu.core_type<tc>, window_params = [{transform_indices = @transform_0, window_bounds = array<i64: 2>}, {transform_indices = @transform_1, window_bounds = array<i64: 1, 16, 4>}, {transform_indices = @transform_2, window_bounds = array<i64: 1, 8, 3>}, {pipeline_mode = #tpu.pipeline_mode<synchronous>, transform_indices = @transform_3, window_bounds = array<i64: 16, 16>}, {pipeline_mode = #tpu.pipeline_mode<synchronous>, transform_indices = @transform_4, window_bounds = array<i64: 24, 16>}, {pipeline_mode = #tpu.pipeline_mode<synchronous>, transform_indices = @transform_5, window_bounds = array<i64: 24, 1>}, {pipeline_mode = #tpu.pipeline_mode<synchronous>, transform_indices = @transform_6, window_bounds = array<i64: 24, 24>}, {pipeline_mode = #tpu.pipeline_mode<synchronous>, transform_indices = @transform_7, window_bounds = array<i64: 24, 1>}, {pipeline_mode = #tpu.pipeline_mode<synchronous>, transform_indices = @transform_8, window_bounds = array<i64: 2, 2>}, {pipeline_mode = #tpu.pipeline_mode<synchronous>, transform_indices = @transform_9, window_bounds = array<i64: 1, 2>}, {pipeline_mode = #tpu.pipeline_mode<synchronous>, transform_indices = @transform_10, window_bounds = array<i64: 2, 32>}, {pipeline_mode = #tpu.pipeline_mode<synchronous>, transform_indices = @transform_11, window_bounds = array<i64: 2, 32>}, {pipeline_mode = #tpu.pipeline_mode<synchronous>, transform_indices = @transform_12, window_bounds = array<i64: 1, 32>}, {pipeline_mode = #tpu.pipeline_mode<synchronous>, transform_indices = @transform_13, window_bounds = array<i64: 32, 32>}, {pipeline_mode = #tpu.pipeline_mode<synchronous>, transform_indices = @transform_14, window_bounds = array<i64: 1, 32>}, {pipeline_mode = #tpu.pipeline_mode<synchronous>, transform_indices = @transform_15, window_bounds = array<i64: 3, 32>}, {pipeline_mode = #tpu.pipeline_mode<synchronous>, transform_indices = @transform_16, window_bounds = array<i64: 32, 32>}, {pipeline_mode = #tpu.pipeline_mode<synchronous>, transform_indices = @transform_17, window_bounds = array<i64: 32, 32>}, {pipeline_mode = #tpu.pipeline_mode<synchronous>, transform_indices = @transform_18, window_bounds = array<i64: 1, 32>}, {pipeline_mode = #tpu.pipeline_mode<synchronous>, transform_indices = @transform_19, window_bounds = array<i64: 32, 32>}, {pipeline_mode = #tpu.pipeline_mode<synchronous>, transform_indices = @transform_20, window_bounds = array<i64: 32, 32>}, {pipeline_mode = #tpu.pipeline_mode<synchronous>, transform_indices = @transform_21, window_bounds = array<i64: 32, 32>}, {pipeline_mode = #tpu.pipeline_mode<synchronous>, transform_indices = @transform_22, window_bounds = array<i64: 1, 32>}, {pipeline_mode = #tpu.pipeline_mode<synchronous>, transform_indices = @transform_23, window_bounds = array<i64: 32, 2>}, {pipeline_mode = #tpu.pipeline_mode<synchronous>, transform_indices = @transform_24, window_bounds = array<i64: 1, 2>}, {transform_indices = @transform_25, window_bounds = array<i64: 1, 8, 2>}]} {
    %c0 = arith.constant 0 : index
    %c0_0 = arith.constant 0 : index
    %c0_1 = arith.constant 0 : index
    %0 = vector.load %arg2[%c0, %c0_0, %c0_1] : memref<1x16x4xf32, #tpu.memory_space<vmem>>, vector<1x16x4xf32>
    %1 = vector.shape_cast %0 : vector<1x16x4xf32> to vector<16x4xf32>
    %2 = vector.extract_strided_slice %1 {offsets = [0, 0], sizes = [16, 2], strides = [1, 1]} : vector<16x4xf32> to vector<16x2xf32>
    %c0_2 = arith.constant 0 : index
    %c0_3 = arith.constant 0 : index
    %3 = vector.load %arg4[%c0_2, %c0_3] : memref<16x16xf32, #tpu.memory_space<vmem>>, vector<16x16xf32>
    %cst = arith.constant dense<0.000000e+00> : vector<16x2xf32>
    %4 = tpu.matmul %3, %2, %cst {dimension_numbers = #tpu.dot_dimension_numbers<[1], [0], [0], [1], [0, 0, 1, 1], [], []>} : vector<16x16xf32>, vector<16x2xf32>, vector<16x2xf32> -> vector<16x2xf32>
    %c0_4 = arith.constant 0 : index
    %c0_5 = arith.constant 0 : index
    %5 = vector.load %arg5[%c0_4, %c0_5] : memref<24x16xf32, #tpu.memory_space<vmem>>, vector<24x16xf32>
    %cst_6 = arith.constant dense<0.000000e+00> : vector<24x2xf32>
    %6 = tpu.matmul %5, %2, %cst_6 {dimension_numbers = #tpu.dot_dimension_numbers<[1], [0], [0], [1], [0, 0, 1, 1], [], []>} : vector<24x16xf32>, vector<16x2xf32>, vector<24x2xf32> -> vector<24x2xf32>
    %c0_7 = arith.constant 0 : index
    %c0_8 = arith.constant 0 : index
    %7 = vector.load %arg6[%c0_7, %c0_8] : memref<24x1xf32, #tpu.memory_space<vmem>>, vector<24x1xf32>
    %8 = vector.broadcast %7 : vector<24x1xf32> to vector<24x2xf32>
    %9 = arith.addf %6, %8 : vector<24x2xf32>
    %cst_9 = arith.constant 0.000000e+00 : f32
    %10 = vector.broadcast %cst_9 : f32 to vector<24x2xf32>
    %11 = arith.maximumf %9, %10 : vector<24x2xf32>
    %c0_10 = arith.constant 0 : index
    %c0_11 = arith.constant 0 : index
    %12 = vector.load %arg7[%c0_10, %c0_11] : memref<24x24xf32, #tpu.memory_space<vmem>>, vector<24x24xf32>
    %cst_12 = arith.constant dense<0.000000e+00> : vector<24x2xf32>
    %13 = tpu.matmul %12, %11, %cst_12 {dimension_numbers = #tpu.dot_dimension_numbers<[1], [0], [0], [1], [0, 0, 1, 1], [], []>} : vector<24x24xf32>, vector<24x2xf32>, vector<24x2xf32> -> vector<24x2xf32>
    %c0_13 = arith.constant 0 : index
    %c0_14 = arith.constant 0 : index
    %14 = vector.load %arg8[%c0_13, %c0_14] : memref<24x1xf32, #tpu.memory_space<vmem>>, vector<24x1xf32>
    %15 = vector.broadcast %14 : vector<24x1xf32> to vector<24x2xf32>
    %16 = arith.addf %13, %15 : vector<24x2xf32>
    %17 = vector.extract_strided_slice %16 {offsets = [16, 0], sizes = [8, 2], strides = [1, 1]} : vector<24x2xf32> to vector<8x2xf32>
    %c0_15 = arith.constant 0 : index
    %c0_16 = arith.constant 0 : index
    %18 = vector.load %arg9[%c0_15, %c0_16] : memref<2x2xf32, #tpu.memory_space<vmem>>, vector<2x2xf32>
    %cst_17 = arith.constant dense<0.000000e+00> : vector<8x2xf32>
    %19 = tpu.matmul %17, %18, %cst_17 {dimension_numbers = #tpu.dot_dimension_numbers<[1], [0], [0], [1], [0, 0, 1, 1], [], []>} : vector<8x2xf32>, vector<2x2xf32>, vector<8x2xf32> -> vector<8x2xf32>
    %c0_18 = arith.constant 0 : index
    %c0_19 = arith.constant 0 : index
    %20 = vector.load %arg10[%c0_18, %c0_19] : memref<1x2xf32, #tpu.memory_space<vmem>>, vector<1x2xf32>
    %21 = vector.broadcast %20 : vector<1x2xf32> to vector<8x2xf32>
    %22 = arith.addf %19, %21 : vector<8x2xf32>
    %c0_20 = arith.constant 0 : index
    %c0_21 = arith.constant 0 : index
    %23 = vector.load %arg11[%c0_20, %c0_21] : memref<2x32xf32, #tpu.memory_space<vmem>>, vector<2x32xf32>
    %cst_22 = arith.constant dense<0.000000e+00> : vector<16x32xf32>
    %24 = tpu.matmul %4, %23, %cst_22 {dimension_numbers = #tpu.dot_dimension_numbers<[1], [0], [0], [1], [0, 0, 1, 1], [], []>} : vector<16x2xf32>, vector<2x32xf32>, vector<16x32xf32> -> vector<16x32xf32>
    %25 = vector.extract_strided_slice %1 {offsets = [0, 2], sizes = [16, 2], strides = [1, 1]} : vector<16x4xf32> to vector<16x2xf32>
    %c0_23 = arith.constant 0 : index
    %c0_24 = arith.constant 0 : index
    %26 = vector.load %arg12[%c0_23, %c0_24] : memref<2x32xf32, #tpu.memory_space<vmem>>, vector<2x32xf32>
    %cst_25 = arith.constant dense<0.000000e+00> : vector<16x32xf32>
    %27 = tpu.matmul %25, %26, %cst_25 {dimension_numbers = #tpu.dot_dimension_numbers<[1], [0], [0], [1], [0, 0, 1, 1], [], []>} : vector<16x2xf32>, vector<2x32xf32>, vector<16x32xf32> -> vector<16x32xf32>
    %28 = arith.addf %24, %27 : vector<16x32xf32>
    %c0_26 = arith.constant 0 : index
    %c0_27 = arith.constant 0 : index
    %29 = vector.load %arg13[%c0_26, %c0_27] : memref<1x32xf32, #tpu.memory_space<vmem>>, vector<1x32xf32>
    %30 = vector.broadcast %29 : vector<1x32xf32> to vector<16x32xf32>
    %31 = arith.addf %28, %30 : vector<16x32xf32>
    %cst_28 = arith.constant 0.000000e+00 : f32
    %32 = vector.broadcast %cst_28 : f32 to vector<16x32xf32>
    %33 = arith.maximumf %31, %32 : vector<16x32xf32>
    %cst_29 = arith.constant dense<0.000000e+00> : vector<32xf32>
    %34 = vector.multi_reduction <add>, %33, %cst_29 [0] : vector<16x32xf32> to vector<32xf32>
    %35 = vector.shape_cast %34 : vector<32xf32> to vector<1x32xf32>
    %cst_30 = arith.constant 1.600000e+01 : f32
    %36 = vector.broadcast %cst_30 : f32 to vector<1x32xf32>
    %37 = arith.divf %35, %36 : vector<1x32xf32>
    %c0_31 = arith.constant 0 : index
    %c0_32 = arith.constant 0 : index
    %38 = vector.load %arg14[%c0_31, %c0_32] : memref<32x32xf32, #tpu.memory_space<vmem>>, vector<32x32xf32>
    %cst_33 = arith.constant dense<0.000000e+00> : vector<16x32xf32>
    %39 = tpu.matmul %33, %38, %cst_33 {dimension_numbers = #tpu.dot_dimension_numbers<[1], [0], [0], [1], [0, 0, 1, 1], [], []>} : vector<16x32xf32>, vector<32x32xf32>, vector<16x32xf32> -> vector<16x32xf32>
    %c0_34 = arith.constant 0 : index
    %c0_35 = arith.constant 0 : index
    %40 = vector.load %arg15[%c0_34, %c0_35] : memref<1x32xf32, #tpu.memory_space<vmem>>, vector<1x32xf32>
    %41 = vector.broadcast %40 : vector<1x32xf32> to vector<16x32xf32>
    %42 = arith.addf %39, %41 : vector<16x32xf32>
    %cst_36 = arith.constant 0.000000e+00 : f32
    %43 = vector.broadcast %cst_36 : f32 to vector<16x32xf32>
    %44 = arith.maximumf %42, %43 : vector<16x32xf32>
    %cst_37 = arith.constant dense<0.000000e+00> : vector<32xf32>
    %45 = vector.multi_reduction <add>, %44, %cst_37 [0] : vector<16x32xf32> to vector<32xf32>
    %46 = vector.shape_cast %45 : vector<32xf32> to vector<1x32xf32>
    %cst_38 = arith.constant 1.600000e+01 : f32
    %47 = vector.broadcast %cst_38 : f32 to vector<1x32xf32>
    %48 = arith.divf %46, %47 : vector<1x32xf32>
    %c0_39 = arith.constant 0 : index
    %c0_40 = arith.constant 0 : index
    %c0_41 = arith.constant 0 : index
    %49 = vector.load %arg3[%c0_39, %c0_40, %c0_41] : memref<1x8x3xf32, #tpu.memory_space<vmem>>, vector<1x8x3xf32>
    %50 = vector.shape_cast %49 : vector<1x8x3xf32> to vector<8x3xf32>
    %c0_42 = arith.constant 0 : index
    %c0_43 = arith.constant 0 : index
    %51 = vector.load %arg17[%c0_42, %c0_43] : memref<32x32xf32, #tpu.memory_space<vmem>>, vector<32x32xf32>
    %cst_44 = arith.constant dense<0.000000e+00> : vector<1x32xf32>
    %52 = tpu.matmul %37, %51, %cst_44 {dimension_numbers = #tpu.dot_dimension_numbers<[1], [0], [0], [1], [0, 0, 1, 1], [], []>} : vector<1x32xf32>, vector<32x32xf32>, vector<1x32xf32> -> vector<1x32xf32>
    %c0_45 = arith.constant 0 : index
    %c0_46 = arith.constant 0 : index
    %53 = vector.load %arg18[%c0_45, %c0_46] : memref<32x32xf32, #tpu.memory_space<vmem>>, vector<32x32xf32>
    %cst_47 = arith.constant dense<0.000000e+00> : vector<1x32xf32>
    %54 = tpu.matmul %48, %53, %cst_47 {dimension_numbers = #tpu.dot_dimension_numbers<[1], [0], [0], [1], [0, 0, 1, 1], [], []>} : vector<1x32xf32>, vector<32x32xf32>, vector<1x32xf32> -> vector<1x32xf32>
    %55 = arith.addf %52, %54 : vector<1x32xf32>
    %c0_48 = arith.constant 0 : index
    %c0_49 = arith.constant 0 : index
    %56 = vector.load %arg16[%c0_48, %c0_49] : memref<3x32xf32, #tpu.memory_space<vmem>>, vector<3x32xf32>
    %cst_50 = arith.constant dense<0.000000e+00> : vector<8x32xf32>
    %57 = tpu.matmul %50, %56, %cst_50 {dimension_numbers = #tpu.dot_dimension_numbers<[1], [0], [0], [1], [0, 0, 1, 1], [], []>} : vector<8x3xf32>, vector<3x32xf32>, vector<8x32xf32> -> vector<8x32xf32>
    %58 = vector.broadcast %55 : vector<1x32xf32> to vector<8x32xf32>
    %59 = arith.addf %57, %58 : vector<8x32xf32>
    %c0_51 = arith.constant 0 : index
    %c0_52 = arith.constant 0 : index
    %60 = vector.load %arg19[%c0_51, %c0_52] : memref<1x32xf32, #tpu.memory_space<vmem>>, vector<1x32xf32>
    %61 = vector.broadcast %60 : vector<1x32xf32> to vector<8x32xf32>
    %62 = arith.addf %59, %61 : vector<8x32xf32>
    %cst_53 = arith.constant 0.000000e+00 : f32
    %63 = vector.broadcast %cst_53 : f32 to vector<8x32xf32>
    %64 = arith.maximumf %62, %63 : vector<8x32xf32>
    %c0_54 = arith.constant 0 : index
    %c0_55 = arith.constant 0 : index
    %65 = vector.load %arg21[%c0_54, %c0_55] : memref<32x32xf32, #tpu.memory_space<vmem>>, vector<32x32xf32>
    %cst_56 = arith.constant dense<0.000000e+00> : vector<1x32xf32>
    %66 = tpu.matmul %48, %65, %cst_56 {dimension_numbers = #tpu.dot_dimension_numbers<[1], [0], [0], [1], [0, 0, 1, 1], [], []>} : vector<1x32xf32>, vector<32x32xf32>, vector<1x32xf32> -> vector<1x32xf32>
    %c0_57 = arith.constant 0 : index
    %c0_58 = arith.constant 0 : index
    %67 = vector.load %arg22[%c0_57, %c0_58] : memref<32x32xf32, #tpu.memory_space<vmem>>, vector<32x32xf32>
    %cst_59 = arith.constant dense<0.000000e+00> : vector<1x32xf32>
    %68 = tpu.matmul %48, %67, %cst_59 {dimension_numbers = #tpu.dot_dimension_numbers<[1], [0], [0], [1], [0, 0, 1, 1], [], []>} : vector<1x32xf32>, vector<32x32xf32>, vector<1x32xf32> -> vector<1x32xf32>
    %69 = arith.addf %66, %68 : vector<1x32xf32>
    %c0_60 = arith.constant 0 : index
    %c0_61 = arith.constant 0 : index
    %70 = vector.load %arg20[%c0_60, %c0_61] : memref<32x32xf32, #tpu.memory_space<vmem>>, vector<32x32xf32>
    %cst_62 = arith.constant dense<0.000000e+00> : vector<8x32xf32>
    %71 = tpu.matmul %64, %70, %cst_62 {dimension_numbers = #tpu.dot_dimension_numbers<[1], [0], [0], [1], [0, 0, 1, 1], [], []>} : vector<8x32xf32>, vector<32x32xf32>, vector<8x32xf32> -> vector<8x32xf32>
    %72 = vector.broadcast %69 : vector<1x32xf32> to vector<8x32xf32>
    %73 = arith.addf %71, %72 : vector<8x32xf32>
    %c0_63 = arith.constant 0 : index
    %c0_64 = arith.constant 0 : index
    %74 = vector.load %arg23[%c0_63, %c0_64] : memref<1x32xf32, #tpu.memory_space<vmem>>, vector<1x32xf32>
    %75 = vector.broadcast %74 : vector<1x32xf32> to vector<8x32xf32>
    %76 = arith.addf %73, %75 : vector<8x32xf32>
    %cst_65 = arith.constant 0.000000e+00 : f32
    %77 = vector.broadcast %cst_65 : f32 to vector<8x32xf32>
    %78 = arith.maximumf %76, %77 : vector<8x32xf32>
    %c0_66 = arith.constant 0 : index
    %c0_67 = arith.constant 0 : index
    %79 = vector.load %arg24[%c0_66, %c0_67] : memref<32x2xf32, #tpu.memory_space<vmem>>, vector<32x2xf32>
    %cst_68 = arith.constant dense<0.000000e+00> : vector<8x2xf32>
    %80 = tpu.matmul %78, %79, %cst_68 {dimension_numbers = #tpu.dot_dimension_numbers<[1], [0], [0], [1], [0, 0, 1, 1], [], []>} : vector<8x32xf32>, vector<32x2xf32>, vector<8x2xf32> -> vector<8x2xf32>
    %c0_69 = arith.constant 0 : index
    %c0_70 = arith.constant 0 : index
    %81 = vector.load %arg25[%c0_69, %c0_70] : memref<1x2xf32, #tpu.memory_space<vmem>>, vector<1x2xf32>
    %82 = vector.broadcast %81 : vector<1x2xf32> to vector<8x2xf32>
    %83 = arith.addf %80, %82 : vector<8x2xf32>
    %c0_71 = arith.constant 0 : index
    %84 = memref.load %arg1[%c0_71] : memref<2xf32, #tpu.memory_space<smem>>
    %c1 = arith.constant 1 : index
    %85 = memref.load %arg1[%c1] : memref<2xf32, #tpu.memory_space<smem>>
    %86 = vector.broadcast %84 : f32 to vector<8x2xf32>
    %87 = arith.mulf %86, %83 : vector<8x2xf32>
    %88 = vector.broadcast %85 : f32 to vector<8x2xf32>
    %89 = arith.mulf %88, %22 : vector<8x2xf32>
    %90 = arith.addf %87, %89 : vector<8x2xf32>
    %c0_72 = arith.constant 0 : index
    %c0_73 = arith.constant 0 : index
    %c0_74 = arith.constant 0 : index
    %91 = vector.load %arg26[%c0_72, %c0_73, %c0_74] : memref<1x8x2xf32, #tpu.memory_space<vmem>>, vector<1x8x2xf32>
    %92 = vector.shape_cast %91 : vector<1x8x2xf32> to vector<8x2xf32>
    %93 = vector.shape_cast %90 : vector<8x2xf32> to vector<1x8x2xf32>
    tpu.vector_store %arg26[%c0_72, %c0_73, %c0_74], %93 {strides = array<i32>} : memref<1x8x2xf32, #tpu.memory_space<vmem>>, vector<1x8x2xf32>,
    return
  }
  func.func @transform_0(%arg0: i32) -> i32 {
    %c0_i32 = arith.constant 0 : i32
    %c0_i32_0 = arith.constant 0 : i32
    return %c0_i32 : i32
  }
  func.func @transform_1(%arg0: i32) -> (i32, i32, i32) {
    %c0_i32 = arith.constant 0 : i32
    %c0_i32_0 = arith.constant 0 : i32
    %c0_i32_1 = arith.constant 0 : i32
    return %arg0, %c0_i32, %c0_i32_0 : i32, i32, i32
  }
  func.func @transform_2(%arg0: i32) -> (i32, i32, i32) {
    %c0_i32 = arith.constant 0 : i32
    %c0_i32_0 = arith.constant 0 : i32
    %c0_i32_1 = arith.constant 0 : i32
    return %arg0, %c0_i32, %c0_i32_0 : i32, i32, i32
  }
  func.func @transform_3(%arg0: i32) -> (i32, i32) {
    %c0_i32 = arith.constant 0 : i32
    %c0_i32_0 = arith.constant 0 : i32
    %c0_i32_1 = arith.constant 0 : i32
    return %c0_i32, %c0_i32_0 : i32, i32
  }
  func.func @transform_4(%arg0: i32) -> (i32, i32) {
    %c0_i32 = arith.constant 0 : i32
    %c0_i32_0 = arith.constant 0 : i32
    %c0_i32_1 = arith.constant 0 : i32
    return %c0_i32, %c0_i32_0 : i32, i32
  }
  func.func @transform_5(%arg0: i32) -> (i32, i32) {
    %c0_i32 = arith.constant 0 : i32
    %c0_i32_0 = arith.constant 0 : i32
    %c0_i32_1 = arith.constant 0 : i32
    return %c0_i32, %c0_i32_0 : i32, i32
  }
  func.func @transform_6(%arg0: i32) -> (i32, i32) {
    %c0_i32 = arith.constant 0 : i32
    %c0_i32_0 = arith.constant 0 : i32
    %c0_i32_1 = arith.constant 0 : i32
    return %c0_i32, %c0_i32_0 : i32, i32
  }
  func.func @transform_7(%arg0: i32) -> (i32, i32) {
    %c0_i32 = arith.constant 0 : i32
    %c0_i32_0 = arith.constant 0 : i32
    %c0_i32_1 = arith.constant 0 : i32
    return %c0_i32, %c0_i32_0 : i32, i32
  }
  func.func @transform_8(%arg0: i32) -> (i32, i32) {
    %c0_i32 = arith.constant 0 : i32
    %c0_i32_0 = arith.constant 0 : i32
    %c0_i32_1 = arith.constant 0 : i32
    return %c0_i32, %c0_i32_0 : i32, i32
  }
  func.func @transform_9(%arg0: i32) -> (i32, i32) {
    %c0_i32 = arith.constant 0 : i32
    %c0_i32_0 = arith.constant 0 : i32
    %c0_i32_1 = arith.constant 0 : i32
    return %c0_i32, %c0_i32_0 : i32, i32
  }
  func.func @transform_10(%arg0: i32) -> (i32, i32) {
    %c0_i32 = arith.constant 0 : i32
    %c0_i32_0 = arith.constant 0 : i32
    %c0_i32_1 = arith.constant 0 : i32
    return %c0_i32, %c0_i32_0 : i32, i32
  }
  func.func @transform_11(%arg0: i32) -> (i32, i32) {
    %c0_i32 = arith.constant 0 : i32
    %c0_i32_0 = arith.constant 0 : i32
    %c0_i32_1 = arith.constant 0 : i32
    return %c0_i32, %c0_i32_0 : i32, i32
  }
  func.func @transform_12(%arg0: i32) -> (i32, i32) {
    %c0_i32 = arith.constant 0 : i32
    %c0_i32_0 = arith.constant 0 : i32
    %c0_i32_1 = arith.constant 0 : i32
    return %c0_i32, %c0_i32_0 : i32, i32
  }
  func.func @transform_13(%arg0: i32) -> (i32, i32) {
    %c0_i32 = arith.constant 0 : i32
    %c0_i32_0 = arith.constant 0 : i32
    %c0_i32_1 = arith.constant 0 : i32
    return %c0_i32, %c0_i32_0 : i32, i32
  }
  func.func @transform_14(%arg0: i32) -> (i32, i32) {
    %c0_i32 = arith.constant 0 : i32
    %c0_i32_0 = arith.constant 0 : i32
    %c0_i32_1 = arith.constant 0 : i32
    return %c0_i32, %c0_i32_0 : i32, i32
  }
  func.func @transform_15(%arg0: i32) -> (i32, i32) {
    %c0_i32 = arith.constant 0 : i32
    %c0_i32_0 = arith.constant 0 : i32
    %c0_i32_1 = arith.constant 0 : i32
    return %c0_i32, %c0_i32_0 : i32, i32
  }
  func.func @transform_16(%arg0: i32) -> (i32, i32) {
    %c0_i32 = arith.constant 0 : i32
    %c0_i32_0 = arith.constant 0 : i32
    %c0_i32_1 = arith.constant 0 : i32
    return %c0_i32, %c0_i32_0 : i32, i32
  }
  func.func @transform_17(%arg0: i32) -> (i32, i32) {
    %c0_i32 = arith.constant 0 : i32
    %c0_i32_0 = arith.constant 0 : i32
    %c0_i32_1 = arith.constant 0 : i32
    return %c0_i32, %c0_i32_0 : i32, i32
  }
  func.func @transform_18(%arg0: i32) -> (i32, i32) {
    %c0_i32 = arith.constant 0 : i32
    %c0_i32_0 = arith.constant 0 : i32
    %c0_i32_1 = arith.constant 0 : i32
    return %c0_i32, %c0_i32_0 : i32, i32
  }
  func.func @transform_19(%arg0: i32) -> (i32, i32) {
    %c0_i32 = arith.constant 0 : i32
    %c0_i32_0 = arith.constant 0 : i32
    %c0_i32_1 = arith.constant 0 : i32
    return %c0_i32, %c0_i32_0 : i32, i32
  }
  func.func @transform_20(%arg0: i32) -> (i32, i32) {
    %c0_i32 = arith.constant 0 : i32
    %c0_i32_0 = arith.constant 0 : i32
    %c0_i32_1 = arith.constant 0 : i32
    return %c0_i32, %c0_i32_0 : i32, i32
  }
  func.func @transform_21(%arg0: i32) -> (i32, i32) {
    %c0_i32 = arith.constant 0 : i32
    %c0_i32_0 = arith.constant 0 : i32
    %c0_i32_1 = arith.constant 0 : i32
    return %c0_i32, %c0_i32_0 : i32, i32
  }
  func.func @transform_22(%arg0: i32) -> (i32, i32) {
    %c0_i32 = arith.constant 0 : i32
    %c0_i32_0 = arith.constant 0 : i32
    %c0_i32_1 = arith.constant 0 : i32
    return %c0_i32, %c0_i32_0 : i32, i32
  }
  func.func @transform_23(%arg0: i32) -> (i32, i32) {
    %c0_i32 = arith.constant 0 : i32
    %c0_i32_0 = arith.constant 0 : i32
    %c0_i32_1 = arith.constant 0 : i32
    return %c0_i32, %c0_i32_0 : i32, i32
  }
  func.func @transform_24(%arg0: i32) -> (i32, i32) {
    %c0_i32 = arith.constant 0 : i32
    %c0_i32_0 = arith.constant 0 : i32
    %c0_i32_1 = arith.constant 0 : i32
    return %c0_i32, %c0_i32_0 : i32, i32
  }
  func.func @transform_25(%arg0: i32) -> (i32, i32, i32) {
    %c0_i32 = arith.constant 0 : i32
    %c0_i32_0 = arith.constant 0 : i32
    %c0_i32_1 = arith.constant 0 : i32
    return %arg0, %c0_i32, %c0_i32_0 : i32, i32, i32
  }
}

</mosaic_0001>

<bundles_post_ra>
// kernel: mixed_concat_forward.1
= control target key start
LH: loop header
LB: loop body
LE: loop exit
PB: predicated region body
PF: predicated region fallthrough
CT: control target
= control target key end

     0   :  { %s3617_s0 = inlined_call_operand.vmem [shape: f32[2], index: 0, kind: input, shape index: {}]   ;;  %s3618_s1 = inlined_call_operand.vmem [shape: f32[2,16,4], index: 1, kind: input, shape index: {}]   ;;  %s3619_s2 = inlined_call_operand.vmem [shape: f32[2,8,3], index: 2, kind: input, shape index: {}]   ;;  %s3620_s3 = inlined_call_operand.vmem [shape: f32[16,16], index: 3, kind: input, shape index: {}]   ;;  %s3621_s4 = inlined_call_operand.vmem [shape: f32[24,16], index: 4, kind: input, shape index: {}]   ;;  %s3622_s5 = inlined_call_operand.vmem [shape: f32[24,1], index: 5, kind: input, shape index: {}]   ;;  %s3623_s6 = inlined_call_operand.vmem [shape: f32[24,24], index: 6, kind: input, shape index: {}]   ;;  %s3624_s7 = inlined_call_operand.vmem [shape: f32[24,1], index: 7, kind: input, shape index: {}]   ;;  %s3625_s8 = inlined_call_operand.hbm [shape: f32[2,2], index: 8, kind: input, shape index: {}]   ;;  %s3626_s9 = inlined_call_operand.vmem [shape: f32[1,2], index: 9, kind: input, shape index: {}]   ;;  %s3627_s10 = inlined_call_operand.hbm [shape: f32[2,32], index: 10, kind: input, shape index: {}]   ;;  %s3628_s11 = inlined_call_operand.hbm [shape: f32[2,32], index: 11, kind: input, shape index: {}]   ;;  %s3629_s12 = inlined_call_operand.hbm [shape: f32[1,32], index: 12, kind: input, shape index: {}]   ;;  %s3630_s13 = inlined_call_operand.vmem [shape: f32[32,32], index: 13, kind: input, shape index: {}]   ;;  %s3631_s14 = inlined_call_operand.hbm [shape: f32[1,32], index: 14, kind: input, shape index: {}]   ;;  %s3632_s15 = inlined_call_operand.hbm [shape: f32[3,32], index: 15, kind: input, shape index: {}]   ;;  %s3633_s16 = inlined_call_operand.vmem [shape: f32[32,32], index: 16, kind: input, shape index: {}]   ;;  %s3634_s17 = inlined_call_operand.vmem [shape: f32[32,32], index: 17, kind: input, shape index: {}]   ;;  %s3635_s18 = inlined_call_operand.hbm [shape: f32[1,32], index: 18, kind: input, shape index: {}]   ;;  %s3636_s19 = inlined_call_operand.vmem [shape: f32[32,32], index: 19, kind: input, shape index: {}]   ;;  %s3637_s20 = inlined_call_operand.vmem [shape: f32[32,32], index: 20, kind: input, shape index: {}]   ;;  %s3638_s21 = inlined_call_operand.vmem [shape: f32[32,32], index: 21, kind: input, shape index: {}]   ;;  %s3639_s22 = inlined_call_operand.hbm [shape: f32[1,32], index: 22, kind: input, shape index: {}]   ;;  %s3640_s23 = inlined_call_operand.vmem [shape: f32[32,2], index: 23, kind: input, shape index: {}]   ;;  %s3641_s24 = inlined_call_operand.vmem [shape: f32[1,2], index: 24, kind: input, shape index: {}]   ;;  %s3642_s25 = inlined_call_operand.vmem [shape: f32[2,8,2], index: 25, kind: output, shape index: {}]  }
   0x1   :  { %3652 = sst [smem:[#allocation24_spill]] %s3617_s0 }
   0x2   :  { %3653 = sst [smem:[#allocation25_spill]] %s3618_s1 }
   0x3   :  { %3654 = sst [smem:[#allocation26_spill]] %s3619_s2 }
   0x4   :  { %3655 = sst [smem:[#allocation27_spill]] %s3620_s3 }
   0x5   :  { %3656 = sst [smem:[#allocation28_spill]] %s3621_s4 }
   0x6   :  { %3657 = sst [smem:[#allocation29_spill]] %s3622_s5 }
   0x7   :  { %3658 = sst [smem:[#allocation30_spill]] %s3623_s6 }
   0x8   :  { %3659 = sst [smem:[#allocation31_spill]] %s3624_s7 }
   0x9   :  { %3660 = sst [smem:[#allocation32_spill]] %s3625_s8 }
   0xa   :  { %3661 = sst [smem:[#allocation33_spill]] %s3626_s9 }
   0xb   :  { %3662 = sst [smem:[#allocation34_spill]] %s3627_s10 }
   0xc   :  { %3663 = sst [smem:[#allocation35_spill]] %s3641_s24 }
   0xd   :  { %3664 = sst [smem:[#allocation36_spill]] %s3642_s25 }
   0xe   :  { %30 = vsyncpa [#allocation4], 0 }
   0xf   :  { %31 = vsyncpa [#allocation3], 0 }
  0x10   :  { %32 = vsyncpa [#allocation7], 0 }
  0x11   :  { %33 = vsyncpa [#allocation10], 0 }
  0x12   :  { %34 = vsyncpa [#allocation13], 0 }
  0x13   :  { %35 = vsyncpa [#allocation16], 0  ;;  %s3158_s29 = smov 0  }
  0x14 LB: > { %3665 = sst [smem:[#allocation23_spill]] %s3012_s29  ;;  %s3014_s2 = smov [#allocation6]   ;;  %s3012_s29 = sphi %s3158_s29, %s41_s29  }
  0x15   : > { %s660_s6 = sshll.u32 %s3014_s2, 4  ;;  %s3164_s30 = sadd.s32 4294967295, %s3012_s29   ;;  %s3169_s6 = int_to_ptr.vmem [resolvable:$true] %s660_s6 }
  0x16   : > { %p2323_p0 = scmp.ge.s32.totalorder %s3012_s29, 1  ;;  %p607_p1 = scmp.lt.s32.totalorder %s3012_s29, 3 }
  0x17   : > { %p3649_p2 = scmp.eq.s32.totalorder %s3164_s30, 0  ;;  %s3015_s3 = smov [#allocation9]  }
  0x18   : > { %p3171_p3 = pnand %p2323_p0, %p607_p1  ;;  %s682_s26 = sshll.u32 %s3015_s3, 4  ;;  %s3177_s26 = int_to_ptr.vmem [resolvable:$true] %s682_s26 }
  0x19   : > { %s3016_s1 = smov [#allocation12]   ;;  %s3667_s28 = sld [smem:[#allocation24_spill]] }
  0x1a   : > { %s3666_s7 = scalar_select %p3171_p3, 1, 0 }
  0x1b   : > { %p2673_p4 = pneg %p3171_p3  ;;  %s707_s8 = sshll.u32 %s3016_s1, 4  ;;  %s3188_s8 = int_to_ptr.vmem [resolvable:$true] %s707_s8 }
  0x1c   : > { %s3669_s10 = sld [smem:[#allocation34_spill]] }
  0x1d   : > { %p3184_p5 = pnand %p3649_p2, %p2673_p4 }
  0x1f   : > { %s620_s9 = sshll.u32 %s3667_s28, 4  ;;  %p3200_p7 = pneg %p3184_p5  ;;  %s3190_s9 = int_to_ptr.vmem [resolvable:$true] %s620_s9 }
  0x22   : > { %s2743_s3 = scalar_lea.hbm %s3669_s10, 32 }
  0x23   : > { %p2744_p6 = scmp.ne.s32.totalorder %s3669_s10, %s2743_s3  ;;  %p2750_p10 = scmp.lt.u32.totalorder %s2743_s3, %s3669_s10 }
  0x25   : > { %p2746_p8 = pnand %p3200_p7, %p2744_p6 }
  0x27   : > { %p2747_p9 = pneg %p2746_p8 }
  0x29   : > { %p2752_p11 = pnand %p2750_p10, %p2747_p9 }
  0x2b   : > { %2755 = shalt.err (!%p2752_p11)
}
  0x2c   : > { %s2756_s29 = scalar_lea.vmem %s3169_s6, 32  ;;  %p2764_p1 = scmp.lt.s32.totalorder %s3169_s6, %s3169_s6 }
  0x2d   : > { %p2757_p12 = scmp.ne.s32.totalorder %s3169_s6, %s2756_s29  ;;  %p2765_p4 = scmp.lt.s32.totalorder %s2756_s29, %s2756_s29 }
  0x2f   : > { %p2759_p13 = pnand %p2757_p12, %p3200_p7  ;;  %p2766_p6 = por %p2765_p4, %p2764_p1 }
  0x31   : > { %p2760_p0 = pneg %p2759_p13 }
  0x33   : > { %p2767_p8 = pnand %p2766_p6, %p2760_p0 }
  0x35   : > { %2770 = shalt.err (!%p2767_p8)
}
  0x36   : > { %2682 = dma.hbm_to_vmem [thread:$0]  (!%p3184_p5), %s3669_s10, 32, %s3169_s6, [#allocation7]  }
  0x37   : > { %s2771_s4 = scalar_lea.hbm %s3629_s12, 16 }
  0x38   : > { %p2772_p9 = scmp.ne.s32.totalorder %s3629_s12, %s2771_s4  ;;  %p2778_p12 = scmp.lt.u32.totalorder %s2771_s4, %s3629_s12 }
  0x3a   : > { %p2774_p10 = pnand %p2772_p9, %p3200_p7 }
  0x3c   : > { %p2775_p11 = pneg %p2774_p10 }
  0x3e   : > { %p2780_p13 = pnand %p2778_p12, %p2775_p11 }
  0x40   : > { %2783 = shalt.err (!%p2780_p13)
}
  0x41   : > { %s2784_s6 = scalar_lea.vmem %s3177_s26, 16  ;;  %s2791_s25 = scalar_lea.vmem %s3177_s26, 32 }
  0x42   : > { %p2785_p0 = scmp.ne.s32.totalorder %s3177_s26, %s2784_s6  ;;  %p2792_p6 = scmp.lt.s32.totalorder %s3177_s26, %s3177_s26 }
  0x43   : > { %p2793_p8 = scmp.lt.s32.totalorder %s2791_s25, %s2784_s6 }
  0x44   : > { %p2787_p1 = pnand %p2785_p0, %p3200_p7 }
  0x45   : > { %p2794_p9 = por %p2793_p8, %p2792_p6 }
  0x46   : > { %p2788_p4 = pneg %p2787_p1 }
  0x48   : > { %p2795_p10 = pnand %p2794_p9, %p2788_p4 }
  0x4a   : > { %2798 = shalt.err (!%p2795_p10)
}
  0x4b   : > { %2688 = dma.hbm_to_vmem [thread:$0]  (!%p3184_p5), %s3629_s12, 16, %s3177_s26, [#allocation10]  }
  0x4c   : > { %s2799_s1 = scalar_lea.hbm %s3632_s15, 64 }
  0x4d   : > { %p2800_p11 = scmp.ne.s32.totalorder %s3632_s15, %s2799_s1  ;;  %p2806_p0 = scmp.lt.u32.totalorder %s2799_s1, %s3632_s15 }
  0x4f   : > { %p2802_p12 = pnand %p2800_p11, %p3200_p7 }
  0x51   : > { %p2803_p13 = pneg %p2802_p12 }
  0x53   : > { %p2808_p1 = pnand %p2806_p0, %p2803_p13 }
  0x55   : > { %2811 = shalt.err (!%p2808_p1)
}
  0x56   : > { %s2812_s26 = scalar_lea.vmem %s3188_s8, 64  ;;  %p2820_p9 = scmp.lt.s32.totalorder %s3188_s8, %s3188_s8 }
  0x57   : > { %p2813_p4 = scmp.ne.s32.totalorder %s3188_s8, %s2812_s26  ;;  %p2821_p10 = scmp.lt.s32.totalorder %s2812_s26, %s2812_s26 }
  0x59   : > { %p2815_p6 = pnand %p2813_p4, %p3200_p7  ;;  %p2822_p11 = por %p2821_p10, %p2820_p9 }
  0x5b   : > { %p2816_p8 = pneg %p2815_p6 }
  0x5d   : > { %p2823_p12 = pnand %p2822_p11, %p2816_p8 }
  0x5f   : > { %2826 = shalt.err (!%p2823_p12)
}
  0x60   : > { %2694 = dma.hbm_to_vmem [thread:$0]  (!%p3184_p5), %s3632_s15, 64, %s3188_s8, [#allocation13]  }
  0x61   : > { %s2827_s0 = scalar_lea.vmem %s3190_s9, 16  ;;  %p2835_p4 = scmp.lt.s32.totalorder %s3190_s9, %s3190_s9 }
  0x62   : > { %p2828_p13 = scmp.ne.s32.totalorder %s3190_s9, %s2827_s0  ;;  %p2836_p6 = scmp.lt.s32.totalorder %s2827_s0, %s2827_s0 }
  0x64   : > { %p2830_p0 = pnand %p2828_p13, %p3200_p7  ;;  %p2837_p8 = por %p2836_p6, %p2835_p4 }
  0x66   : > { %p2831_p1 = pneg %p2830_p0 }
  0x68   : > { %p2838_p9 = pnand %p2837_p8, %p2831_p1 }
  0x6a   : > { %2841 = shalt.err (!%p2838_p9)
}
  0x6b   : > { %s3017_s2 = smov [#allocation2]   ;;  %s3018_s3 = smov [#allocation5]  }
  0x6c   : > { %2676 = dma.vmem_to_smem (!%p3184_p5), %s3190_s9, 16, %s3017_s2, [#allocation4]  }
  0x6d   : > { %s646_s1 = sshll.u32 %s3018_s3, 4  ;;  %s3019_s8 = smov [#allocation8]   ;;  %s647_s1 = int_to_ptr.vmem [resolvable:$true] %s646_s1 }
  0x6e   : > { %s671_s4 = sshll.u32 %s3019_s8, 4  ;;  %s3671_s6 = sld [smem:[#allocation32_spill]]  ;;  %s672_s4 = int_to_ptr.vmem [resolvable:$true] %s671_s4 }
  0x74   : > { %s2842_s26 = scalar_lea.hbm %s3671_s6, 32 }
  0x75   : > { %p2843_p10 = scmp.ne.s32.totalorder %s3671_s6, %s2842_s26  ;;  %p2849_p13 = scmp.lt.u32.totalorder %s2842_s26, %s3671_s6 }
  0x77   : > { %p2845_p11 = pnand %p2843_p10, %p3200_p7 }
  0x79   : > { %p2846_p12 = pneg %p2845_p11 }
  0x7b   : > { %p2851_p0 = pnand %p2849_p13, %p2846_p12 }
  0x7d   : > { %2854 = shalt.err (!%p2851_p0)
}
  0x7e   : > { %s2855_s9 = scalar_lea.vmem %s647_s1, 32  ;;  %p2863_p8 = scmp.lt.s32.totalorder %s647_s1, %s647_s1 }
  0x7f   : > { %p2856_p1 = scmp.ne.s32.totalorder %s647_s1, %s2855_s9  ;;  %p2864_p9 = scmp.lt.s32.totalorder %s2855_s9, %s2855_s9 }
  0x81   : > { %p2858_p4 = pnand %p2856_p1, %p3200_p7  ;;  %p2865_p2 = por %p2864_p9, %p2863_p8 }
  0x83   : > { %p2859_p6 = pneg %p2858_p4 }
  0x85   : > { %p2866_p3 = pnand %p2865_p2, %p2859_p6 }
  0x87   : > { %2869 = shalt.err (!%p2866_p3)
}
  0x88   : > { %2679 = dma.hbm_to_vmem [thread:$0]  (!%p3184_p5), %s3671_s6, 32, %s647_s1, [#allocation3]  }
  0x89   : > { %s2870_s28 = scalar_lea.hbm %s3628_s11, 32 }
  0x8a   : > { %p2871_p10 = scmp.ne.s32.totalorder %s3628_s11, %s2870_s28  ;;  %p2877_p3 = scmp.lt.u32.totalorder %s2870_s28, %s3628_s11 }
  0x8c   : > { %p2873_p11 = pnand %p2871_p10, %p3200_p7 }
  0x8e   : > { %p2874_p2 = pneg %p2873_p11 }
  0x90   : > { %p2879_p12 = pnand %p2877_p3, %p2874_p2 }
  0x92   : > { %2882 = shalt.err (!%p2879_p12)
}
  0x93   : > { %s2883_s0 = scalar_lea.vmem %s672_s4, 32  ;;  %p2891_p4 = scmp.lt.s32.totalorder %s672_s4, %s672_s4 }
  0x94   : > { %p2884_p13 = scmp.ne.s32.totalorder %s672_s4, %s2883_s0  ;;  %p2892_p6 = scmp.lt.s32.totalorder %s2883_s0, %s2883_s0 }
  0x96   : > { %p2886_p0 = pnand %p2884_p13, %p3200_p7  ;;  %p2893_p8 = por %p2892_p6, %p2891_p4 }
  0x98   : > { %p2887_p1 = pneg %p2886_p0 }
  0x9a   : > { %p2894_p9 = pnand %p2893_p8, %p2887_p1 }
  0x9c   : > { %2897 = shalt.err (!%p2894_p9)
}
  0x9d   : > { %2685 = dma.hbm_to_vmem [thread:$0]  (!%p3184_p5), %s3628_s11, 32, %s672_s4, [#allocation7]  }
  0x9e   : > { %s3020_s2 = smov [#allocation11]   ;;  %s3021_s10 = smov [#allocation14]  }
  0x9f   : > { %s696_s3 = sshll.u32 %s3020_s2, 4  ;;  %s724_s8 = sshll.u32 %s3021_s10, 4  ;;  %s697_s3 = int_to_ptr.vmem [resolvable:$true] %s696_s3  ;;  %s725_s8 = int_to_ptr.vmem [resolvable:$true] %s724_s8 }
  0xa0   : > { %s2898_s26 = scalar_lea.hbm %s3631_s14, 16 }
  0xa1   : > { %p2899_p10 = scmp.ne.s32.totalorder %s3631_s14, %s2898_s26  ;;  %p2905_p3 = scmp.lt.u32.totalorder %s2898_s26, %s3631_s14 }
  0xa3   : > { %p2901_p11 = pnand %p2899_p10, %p3200_p7 }
  0xa5   : > { %p2902_p2 = pneg %p2901_p11 }
  0xa7   : > { %p2907_p12 = pnand %p2905_p3, %p2902_p2 }
  0xa9   : > { %2910 = shalt.err (!%p2907_p12)
}
  0xaa   : > { %s2911_s4 = scalar_lea.vmem %s697_s3, 16  ;;  %s2918_s9 = scalar_lea.vmem %s697_s3, 32 }
  0xab   : > { %p2912_p13 = scmp.ne.s32.totalorder %s697_s3, %s2911_s4  ;;  %p2919_p4 = scmp.lt.s32.totalorder %s697_s3, %s697_s3 }
  0xac   : > { %p2920_p6 = scmp.lt.s32.totalorder %s2918_s9, %s2911_s4 }
  0xad   : > { %p2914_p0 = pnand %p2912_p13, %p3200_p7 }
  0xae   : > { %p2921_p8 = por %p2920_p6, %p2919_p4 }
  0xaf   : > { %p2915_p1 = pneg %p2914_p0 }
  0xb1   : > { %p2922_p9 = pnand %p2921_p8, %p2915_p1 }
  0xb3   : > { %2925 = shalt.err (!%p2922_p9)
}
  0xb4   : > { %2691 = dma.hbm_to_vmem [thread:$0]  (!%p3184_p5), %s3631_s14, 16, %s697_s3, [#allocation10]  }
  0xb5   : > { %s2926_s26 = scalar_lea.hbm %s3635_s18, 16 }
  0xb6   : > { %p2927_p10 = scmp.ne.s32.totalorder %s3635_s18, %s2926_s26  ;;  %p2933_p3 = scmp.lt.u32.totalorder %s2926_s26, %s3635_s18 }
  0xb8   : > { %p2929_p11 = pnand %p2927_p10, %p3200_p7 }
  0xba   : > { %p2930_p2 = pneg %p2929_p11 }
  0xbc   : > { %p2935_p12 = pnand %p2933_p3, %p2930_p2 }
  0xbe   : > { %2938 = shalt.err (!%p2935_p12)
}
  0xbf   : > { %s2939_s4 = scalar_lea.vmem %s725_s8, 16  ;;  %s2946_s3 = scalar_lea.vmem %s725_s8, 32 }
  0xc0   : > { %p2940_p13 = scmp.ne.s32.totalorder %s725_s8, %s2939_s4  ;;  %p2947_p4 = scmp.lt.s32.totalorder %s725_s8, %s725_s8 }
  0xc1   : > { %p2948_p6 = scmp.lt.s32.totalorder %s2946_s3, %s2939_s4 }
  0xc2   : > { %p2942_p0 = pnand %p2940_p13, %p3200_p7 }
  0xc3   : > { %p2949_p8 = por %p2948_p6, %p2947_p4 }
  0xc4   : > { %p2943_p1 = pneg %p2942_p0 }
  0xc6   : > { %p2950_p9 = pnand %p2949_p8, %p2943_p1 }
  0xc8   : > { %2953 = shalt.err (!%p2950_p9)
}
  0xc9   : > { %2697 = dma.hbm_to_vmem [thread:$0]  (!%p3184_p5), %s3635_s18, 16, %s725_s8, [#allocation13]  }
  0xca   : > { %s3022_s10 = smov [#allocation15]   ;;  %s2954_s25 = scalar_lea.hbm %s3639_s22, 16 }
  0xcb   : > { %s744_s28 = sshll.u32 %s3022_s10, 4  ;;  %p2955_p10 = scmp.ne.s32.totalorder %s3639_s22, %s2954_s25  ;;  %s745_s28 = int_to_ptr.vmem [resolvable:$true] %s744_s28 }
  0xcc   : > { %p2961_p3 = scmp.lt.u32.totalorder %s2954_s25, %s3639_s22 }
  0xcd   : > { %p2957_p11 = pnand %p2955_p10, %p3200_p7 }
  0xcf   : > { %p2958_p2 = pneg %p2957_p11 }
  0xd1   : > { %p2963_p12 = pnand %p2961_p3, %p2958_p2 }
  0xd3   : > { %2966 = shalt.err (!%p2963_p12)
}
  0xd4   : > { %s2967_s8 = scalar_lea.vmem %s745_s28, 16  ;;  %s2974_s3 = scalar_lea.vmem %s745_s28, 32 }
  0xd5   : > { %p2968_p13 = scmp.ne.s32.totalorder %s745_s28, %s2967_s8  ;;  %p2975_p4 = scmp.lt.s32.totalorder %s745_s28, %s745_s28 }
  0xd6   : > { %p2976_p6 = scmp.lt.s32.totalorder %s2974_s3, %s2967_s8 }
  0xd7   : > { %p2970_p0 = pnand %p2968_p13, %p3200_p7 }
  0xd8   : > { %p2977_p8 = por %p2976_p6, %p2975_p4 }
  0xd9   : > { %p2971_p1 = pneg %p2970_p0 }
  0xdb   : > { %p2978_p9 = pnand %p2977_p8, %p2971_p1 }
  0xdd   : > { %2981 = shalt.err (!%p2978_p9)
}
  0xde   : > { %2700 = dma.hbm_to_vmem [thread:$0]  (!%p3184_p5), %s3639_s22, 16, %s745_s28, [#allocation16]  }
  0xdf   : > { %p3672_p10 = scmp.ne.s32.totalorder %s3666_s7, 0 }
  0xe0   : > { %p3673_p11 = scmp.eq.s32.totalorder (!%p3672_p10), %s3164_s30, 0 }
  0xe1   : > { %778 = sbr.rel (%p3672_p10) target bundleno = 1847 (0x737), region = 120 }
  0xe8   : > { %2987 = dma.done.wait (%p3673_p11), [#allocation4], 16   ;;  %p3674_p7 = pmov %p3673_p11 }
  0xea   : > { %2989 = vsyncadd (%p3674_p7), [#allocation4], 4294967280  ;;  %p3675_p2 = pmov %p3674_p7 }
  0xec   : > { %2991 = dma.done.wait (%p3675_p2), [#allocation3], 32   ;;  %p3676_p3 = pmov %p3675_p2 }
  0xed   : > { %p3677_p12 = pmov %p3675_p2 }
  0xee   : > { %2993 = vsyncadd (%p3676_p3), [#allocation3], 4294967264 }
  0xef   : > { %2995 = dma.done.wait (%p3677_p12), [#allocation7], 64   ;;  %p3678_p5 = pmov %p3675_p2 }
  0xf0   : > { %p3679_p13 = pmov %p3675_p2 }
  0xf1   : > { %2997 = vsyncadd (%p3678_p5), [#allocation7], 4294967232 }
  0xf2   : > { %2999 = dma.done.wait (%p3679_p13), [#allocation10], 32   ;;  %p3680_p0 = pmov %p3675_p2 }
  0xf4   : > { %3001 = vsyncadd (%p3680_p0), [#allocation10], 4294967264  ;;  %p3681_p1 = pmov %p3680_p0 }
  0xf5   : > { %p3682_p4 = pmov %p3680_p0 }
  0xf6   : > { %3003 = dma.done.wait (%p3681_p1), [#allocation13], 80  }
  0xf7   : > { %3005 = vsyncadd (%p3682_p4), [#allocation13], 4294967216  ;;  %p3683_p6 = pmov %p3680_p0 }
  0xf8   : > { %p3684_p8 = pmov %p3680_p0 }
  0xf9   : > { %3007 = dma.done.wait (%p3683_p6), [#allocation16], 16  }
  0xfa   : > { %3009 = vsyncadd (%p3684_p8), [#allocation16], 4294967280 }
  0xfb   : > { %816 = sfence }
  0xfc   : > { %p882_p9 = scmp.lt.s32.totalorder %s3164_s30, 1  ;;  %v3023_v0 = vmov 0.0|0.0   ;;  %vm3024_vm0 = vmmov 0   ;;  %v3025_v1 = vmov 0.0   ;;  %s3685_s27 = sld [smem:[#allocation29_spill]]  ;;  %v3026_v3 = vmov 0  }
  0xfd   : > { %2581 = vmatprep.subr.bf16.mxu1 %v3023_v0  ;;  %2456 = vmatprep.mubr.msk.f32.mxu1 %vm3024_vm0, %v3025_v1  ;;  %s3686_s1 = sld [smem:[#allocation31_spill]]  ;;  %s3687_s3 = sld [smem:[#allocation25_spill]]  ;;  %vm899_vm1 = vcmask 130048   ;;  %vm1113_vm2 = vcmask 195584   ;;  %v1201_v36 = vld [vmem:[#allocation5] sm:$0x3] }
  0xfe   : > { %s3697_s30 = smov (!%p882_p9, %s3164_s30), 1  ;;  %2741 = vset.pattern.permute.xlu0 %v3026_v3  ;;  %2742 = vset.pattern.permute.xlu1 %v3026_v3  ;;  %s3688_s5 = sld [smem:[#allocation28_spill]]  ;;  %vm1213_vm3 = vcmask 1041408   ;;  %v1288_v37 = vld [vmem:[#allocation8] sm:$0x3]  ;;  %vm1209_vm4 = vcmask 15360  }
  0xff   : > { %s2383_s29 = sshll.u32 %s3697_s30, 4  ;;  %s3689_s0 = sld [smem:[#allocation27_spill]]  ;;  %v1287_v47 = vld [vmem:[#allocation6] sm:$0x3]  ;;  %v1485_v50 = vld [vmem:[%s3630_s13 + $0x8] sm:$0xff]  ;;  %v1486_v52 = vld [vmem:[%s3630_s13 + $0x10] sm:$0xff] }
 0x100   : > { %s3027_s8 = smov 126   ;;  %s3690_s2 = sld [smem:[#allocation30_spill]]  ;;  %v1484_v49 = vld [vmem:[%s3630_s13] sm:$0xff]  ;;  %v1487_v53 = vld [vmem:[%s3630_s13 + $0x18] sm:$0xff]  ;;  %vm1472_vm5 = vcmask 261120   ;;  %vm1752_vm6 = vcmask 1042432  }
 0x101   : > { %v2587_v51 = vpack.c.bf16 %v1485_v50, %v1484_v49  ;;  %v2591_v54 = vpack.c.bf16 %v1487_v53, %v1486_v52  ;;  %v2365_v57 = vld [vmem:[#allocation9] ss:$0 sm:$0xff]  ;;  %s2346_s4 = sshll.u32 %s3697_s30, 3  ;;  %v1743_v53 = vld [vmem:[#allocation12] sm:$0x7]  ;;  %vm1748_vm7 = vcmask 23552  }
 0x102   : > { %v984_v2 = vld [vmem:[%s3685_s27] sm:$0xff]  ;;  %v986_v4 = vld [vmem:[%s3685_s27 + $0x10] sm:$0xff]  ;;  %v985_v5 = vld [vmem:[%s3685_s27 + $0x8] sm:$0xff]  ;;  %s2380_s24 = sld [smem:[#allocation2 + $0x1]]  ;;  %s3693_s28 = sld [smem:[#allocation35_spill]] }
 0x103   : > { %989 = vperm.xlu0 %2741, %v984_v2   ;;  %999 = vperm.xlu1 %2742, %v986_v4   ;;  %v1099_v6 = vld [vmem:[%s3686_s1 + $0x10] sm:$0xff]  ;;  %s886_s9 = scalar_lea.vmem %s3687_s3, %s2383_s29  ;;  %s2157_s1 = sld [smem:[#allocation2]] }
 0x104   : > { %v895_v7 = vld [vmem:[%s886_s9] sm:$0xff]  ;;  %v896_v8 = vld [vmem:[%s886_s9 + $0x8] sm:$0xff]  ;;  %v983_v12 = vld [vmem:[%s3688_s5 + $0x10] sm:$0xff]  ;;  %s3691_s9 = sld [smem:[#allocation26_spill]]  ;;  %s3694_s25 = sld [smem:[#allocation36_spill]] }
 0x105   : > { %v2577_v9 = vpack.c.bf16 %v896_v8, %v895_v7  ;;  %v981_v10 = vld [vmem:[%s3688_s5] sm:$0xff]  ;;  %v982_v11 = vld [vmem:[%s3688_s5 + $0x8] sm:$0xff] }
 0x106   : > { %v897_v13 = vld [vmem:[%s3689_s0] sm:$0xff]  ;;  %v898_v14 = vld [vmem:[%s3689_s0 + $0x8] sm:$0xff]  ;;  %v1096_v33 = vld [vmem:[%s3690_s2 + $0x10] sm:$0xff] }
 0x107   : > { %994 = vperm.xlu0 %2741, %v985_v5   ;;  %1110 = vperm.xlu1 %2742, %v1099_v6   ;;  %v1094_v31 = vld [vmem:[%s3690_s2] sm:$0xff]  ;;  %v1095_v32 = vld [vmem:[%s3690_s2 + $0x8] sm:$0xff] }
 0x108   : > { %2583 = vmatpush3.bf16.msra.mxu1 %v2577_v9  ;;  %2578 = vmatprep.subr.bf16.mxu0 %v2577_v9  ;;  %v1593_v5 = vld [vmem:[%s3634_s17] sm:$0xff]  ;;  %v1594_v6 = vld [vmem:[%s3634_s17 + $0x8] sm:$0xff] }
 0x109   : > { %2580 = vmatpush3.bf16.msra.mxu0 %v2577_v9  ;;  %2480 = vmatprep.subr.mxu1 %v3025_v1  ;;  %v1840_v9 = vld [vmem:[%s3638_s21 + $0x8] sm:$0xff] }
 0x10a   : > { %2584 = vmatprep.subr.bf16.mxu0 %v3023_v0  ;;  %2449 = vmatprep.mubr.msk.f32.mxu0 %vm899_vm1, %v897_v13  ;;  %v1841_v13 = vld [vmem:[%s3638_s21 + $0x10] sm:$0xff]  ;;  %s890_s7 = scalar_lea.vmem %s3691_s9, %s2346_s4  ;;  %s3692_s9 = sld [smem:[#allocation33_spill]] }
 0x10b   : > { %2457 = vmatmul.mubr.msk.f32.vlgmr.msra.gmra.mrb[0].mxu1 %vm899_vm1, %v981_v10  ;;  %1291 = vrot.lane.b32.xlu0 %v895_v7, %s3027_s8  ;;  %v1839_v7 = vld [vmem:[%s3638_s21] sm:$0xff]  ;;  %s894_s0 = scalar_lea.vmem %s3694_s25, %s2346_s4 }
 0x10c   : > { %2459 = vmatprep.mubr.msk.f32.mxu1 %vm3024_vm0, %v3025_v1  ;;  %2450 = vmatmul.mubr.msk.f32.vlgmr.msra.gmra.mrb[0].mxu0 %vm899_vm1, %v898_v14  ;;  %v2608_v10 = vpack.c.bf16 %v1840_v9, %v1839_v7  ;;  %v2373_v9 = vld [vmem:[#allocation14] ss:$0 sm:$0xff] }
 0x10d   : > { %2471 = vmatprep.mubr.msk.f32.mxu0 %vm3024_vm0, %v3025_v1  ;;  %1293 = vrot.lane.b32.xlu1 %v896_v8, %s3027_s8  ;;  %v2596_v8 = vpack.c.bf16 %v1594_v6, %v1593_v5 }
 0x10e   : > { %2481 = vmatpush3.msk.msra.mxu1 %vm1213_vm3, %v1201_v36 }
 0x10f   : > { %2460 = vmatmul.mubr.msk.f32.gmra.mrb[2].mxu1 %vm899_vm1, %v982_v11  ;;  %2485 = vmatprep.subr.msk.mxu1 %vm1213_vm3, %v1288_v37  ;;  %v1595_v11 = vld [vmem:[%s3634_s17 + $0x10] sm:$0xff] }
 0x110   : > { %2462 = vmatprep.mubr.msk.f32.mxu1 %vm3024_vm0, %v3025_v1 }
 0x113   : > { %2463 = vmatmul.mubr.msk.f32.gmra.mrb[4].mxu1 %vm899_vm1, %v983_v12  ;;  %v1596_v12 = vld [vmem:[%s3634_s17 + $0x18] sm:$0xff] }
 0x114   : > { %2482 = vmatprep.mubr.msk.f32.mxu1 %vm3024_vm0, %v3025_v1  ;;  %v2599_v14 = vpack.c.bf16 %v1596_v12, %v1595_v11 }
 0x182   : > { %v990_v15 = vpop.permute.xlu0 %989  ;;  %v1000_v25 = vpop.permute.xlu1 %999 }
 0x186   : > { %v995_v19 = vpop.permute.xlu0 %994  ;;  %v1111_v42 = vpop.permute.xlu1 %1110 }
 0x18a   : > { %v1292_v46 = vpop.permute.xlu0 %1291  ;;  %v1294_v48 = vpop.permute.xlu1 %1293 }
 0x1de   : > { %v1077_v16 = vpop.f32.mrb[0].mxu1 }
 0x1df   : > { %v2458_v17 = vpop.f32.mrb[1].mxu1  ;;  %v1078_v18 = vadd.f32 %v1077_v16, %v990_v15  ;;  %v2451_v34 = vpop.f32.mrb[0].mxu0  ;;  %v1842_v15 = vld [vmem:[%s3638_s21 + $0x18] sm:$0xff] }
 0x1e0   : > { %v972_v35 = vpop.f32.mrb[1].mxu0  ;;  %v2611_v16 = vpack.c.bf16 %v1842_v15, %v1841_v13  ;;  %v2366_v17 = vld [vmem:[#allocation11] ss:$0 sm:$0xff] }
 0x1e1   : > { %v1091_v23 = vmax.f32 %v1078_v18, 0.0  ;;  %v2074_v15 = vld [vmem:[%s3640_s23 + $0x8] sm:$0xff] }
 0x1e2   : > { %v1082_v20 = vpop.f32.mrb[2].mxu1 }
 0x1e3   : > { %v1083_v21 = vadd.f32 %v1082_v20, %v995_v19  ;;  %v2461_v22 = vpop.f32.mrb[3].mxu1 }
 0x1e5   : > { %v1092_v24 = vmax.f32 %v1083_v21, 0.0 }
 0x1e6   : > { %v1087_v26 = vpop.f32.mrb[4].mxu1 }
 0x1e7   : > { %v2585_v27 = vpack.c.bf16 %v1092_v24, %v1091_v23  ;;  %v1088_v28 = vadd.f32 %v1087_v26, %v1000_v25  ;;  %v2464_v29 = vpop.f32.mrb[5].mxu1 }
 0x1e9   : > { %v1093_v30 = vmax.f32 %v1088_v28, 0.0  ;;  %2586 = vmatpush3.bf16.msra.mxu0 %v2585_v27 }
 0x1ea   : > { %2469 = vmatprep.subr.mxu0 %v3025_v1 }
 0x1ed   : > { %2470 = vmatpush3.msra.mxu0 %v1093_v30 }
 0x1ee   : > { %2472 = vmatmul.mubr.msk.f32.vlgmr.msra.gmra.mrb[2].mxu0 %vm1113_vm2, %v1094_v31  ;;  %2588 = vmatprep.subr.bf16.mxu0 %v2587_v51 }
 0x1ef   : > { %2474 = vmatprep.mubr.msk.f32.mxu0 %vm3024_vm0, %v3025_v1  ;;  %2590 = vmatpush3.bf16.msra.mxu0 %v2587_v51 }
 0x1f0   : > { %2592 = vmatprep.subr.bf16.mxu0 %v2591_v54 }
 0x1f2   : > { %2475 = vmatmul.mubr.msk.f32.gmra.mrb[4].mxu0 %vm1113_vm2, %v1095_v32 }
 0x1f3   : > { %2477 = vmatprep.mubr.msk.f32.mxu0 %vm3024_vm0, %v3025_v1  ;;  %2594 = vmatpush3.bf16.msra.mxu0 %v2591_v54  ;;  %v1588_v54 = vld [vmem:[%s890_s7] sm:$0xff] }
 0x1f4   : > { %2595 = vmatprep.subr.bf16.mxu0 %v3023_v0 }
 0x1f6   : > { %2478 = vmatmul.mubr.msk.f32.gmra.mrb[6].mxu0 %vm1113_vm2, %v1096_v33 }
 0x2c1   : > { %v1189_v38 = vpop.f32.mrb[2].mxu0 }
 0x2c2   : > { %v2473_v39 = vpop.f32.mrb[3].mxu0  ;;  %v1835_v38 = vld [vmem:[%s3637_s20] sm:$0xff] }
 0x2c3   : > { %v1836_v39 = vld [vmem:[%s3637_s20 + $0x8] sm:$0xff] }
 0x2c5   : > { %v1193_v40 = vpop.f32.mrb[4].mxu0 }
 0x2c6   : > { %v2476_v41 = vpop.f32.mrb[5].mxu0 }
 0x2c9   : > { %v1197_v43 = vpop.f32.mrb[6].mxu0 }
 0x2ca   : > { %v1198_v44 = vadd.f32 %v1197_v43, %v1111_v42  ;;  %v2479_v45 = vpop.f32.mrb[7].mxu0  ;;  %v2614_v42 = vpack.c.bf16 %v1836_v39, %v1835_v38  ;;  %v1591_v43 = vld [vmem:[%s3633_s16 + $0x10] sm:$0xff] }
 0x2cc   : > { %2483 = vmatmul.mubr.msk.f32.vlgmr.msra.gmra.mrb[6].mxu1 %vm1209_vm4, %v1198_v44 }
 0x2cd   : > { %2486 = vmatpush3.msk.msra.mxu1 %vm1213_vm3, %v1288_v37  ;;  %2487 = vmatprep.mubr.msk.f32.mxu1 %vm1209_vm4, %v1292_v46  ;;  %v1590_v37 = vld [vmem:[%s3633_s16 + $0x8] sm:$0xff]  ;;  %v1592_v46 = vld [vmem:[%s3633_s16 + $0x18] sm:$0xff] }
 0x2ce   : > { %2490 = vmatprep.subr.msk.mxu1 %vm1213_vm3, %v1287_v47  ;;  %v2605_v49 = vpack.c.bf16 %v1592_v46, %v1591_v43 }
 0x2d0   : > { %2488 = vmatmul.mubr.msk.f32.vlgmr.msra.gmra.mrb[8].mxu1 %vm1209_vm4, %v1294_v48  ;;  %v1838_v48 = vld [vmem:[%s3637_s20 + $0x18] sm:$0xff] }
 0x2d1   : > { %2491 = vmatpush3.msk.msra.mxu1 %vm1213_vm3, %v1287_v47  ;;  %2492 = vmatprep.mubr.msk.f32.mxu1 %vm1209_vm4, %v972_v35  ;;  %v1837_v47 = vld [vmem:[%s3637_s20 + $0x10] sm:$0xff] }
 0x2d2   : > { %2607 = vmatprep.subr.bf16.mxu1 %v3023_v0  ;;  %v2617_v50 = vpack.c.bf16 %v1838_v48, %v1837_v47 }
 0x2d8   : > { %2493 = vmatmul.mubr.msk.f32.vlgmr.msra.gmra.mrb[8].mxu1 %vm1209_vm4, %v2451_v34  ;;  %v1589_v34 = vld [vmem:[%s3633_s16] sm:$0xff] }
 0x2d9   : > { %2541 = vmatprep.mubr.msk.f32.mxu1 %vm3024_vm0, %v3025_v1  ;;  %2609 = vmatpush3.bf16.msra.mxu1 %v2608_v10  ;;  %v2602_v41 = vpack.c.bf16 %v1590_v37, %v1589_v34 }
 0x2da   : > { %2610 = vmatprep.subr.bf16.mxu1 %v3023_v0 }
 0x2dd   : > { %2612 = vmatpush3.bf16.msra.mxu1 %v2611_v16 }
 0x2de   : > { %2613 = vmatprep.subr.bf16.mxu1 %v3023_v0 }
 0x39f   : > { %v3486_v55 = vpop.f32.mrb[6].mxu1 }
 0x3a0   : > { %v2484_v56 = vpop.f32.mrb[7].mxu1 }
 0x3a1   : > { %v1983_v56 = vld [vmem:[%s3636_s19] sm:$0xff] }
 0x3ab   : > { %v2494_v58 = vpop.f32.mrb[8].mxu1 }
 0x3ac   : > { %v1469_v59 = vadd.f32 %v2494_v58, %v2365_v57  ;;  %v1452_v60 = vpop.f32.mrb[9].mxu1 }
 0x3ad   : > { %v1468_v61 = vadd.f32 %v2365_v57, %v1452_v60  ;;  %v1984_v57 = vld [vmem:[%s3636_s19 + $0x8] sm:$0xff] }
 0x3ae   : > { %v1471_v62 = vmax.f32 %v1469_v59, 0.0  ;;  %v2620_v58 = vpack.c.bf16 %v1984_v57, %v1983_v56  ;;  %v1985_v59 = vld [vmem:[%s3636_s19 + $0x10] sm:$0xff] }
 0x3af   : > { %v1470_v63 = vmax.f32 %v1468_v61, 0.0  ;;  %v1744_v61 = vlaneseq }
 0x3b0   : > { %v1474_v2 = vsel %vm1472_vm5, %v1471_v62, 0.0 }
 0x3b1   : > { %v1473_v3 = vsel %vm1472_vm5, %v1470_v63, 0.0  ;;  %2503 = vmatprep.mubr.msk.f32.mxu0 %vm1472_vm5, %v1470_v63 }
 0x3b2   : > { %v1475_v4 = vadd.f32 %v1474_v2, %v1473_v3  ;;  %2504 = vmatmul.mubr.msk.f32.vlgmr.msra.gmra.mrb[8].mxu0 %vm1472_vm5, %v1471_v62  ;;  %v1745_v62 = vshrl.u32 %v1744_v61, 7 }
 0x3b3   : > { %2514 = vmatprep.mubr.msk.f32.mxu0 %vm3024_vm0, %v3025_v1  ;;  %2597 = vmatpush3.bf16.msra.mxu0 %v2596_v8 }
 0x3b4   : > { %2598 = vmatprep.subr.bf16.mxu0 %v3023_v0  ;;  %v1476_v24 = vrot.slane %v1475_v4, 4  ;;  %v1746_v63 = vsub.s32 0, %v1745_v62 }
 0x3b6   : > { %v1477_v28 = vadd.f32 %v1476_v24, %v1475_v4 }
 0x3b7   : > { %2600 = vmatpush3.bf16.msra.mxu0 %v2599_v14  ;;  %v2073_v14 = vld [vmem:[%s3640_s23] sm:$0xff] }
 0x3b8   : > { %2601 = vmatprep.subr.bf16.mxu0 %v3023_v0  ;;  %v1478_v31 = vrot.slane %v1477_v28, 2  ;;  %v2626_v16 = vpack.c.bf16 %v2074_v15, %v2073_v14 }
 0x3ba   : > { %v1479_v35 = vadd.f32 %v1478_v31, %v1477_v28  ;;  %v2161_v28 = vstv %s2380_s24 }
 0x3bc   : > { %v1480_v44 = vrot.slane %v1479_v35, 1 }
 0x3be   : > { %v1481_v51 = vadd.f32 %v1480_v44, %v1479_v35 }
 0x3c0   : > { %v1483_v52 = vmul.f32 0.0625, %v1481_v51 }
 0x485   : > { %v2505_v18 = vpop.f32.mrb[8].mxu0 }
 0x486   : > { %v1573_v19 = vadd.f32 %v2505_v18, %v2366_v17  ;;  %v1567_v20 = vpop.f32.mrb[9].mxu0  ;;  %v2076_v18 = vld [vmem:[%s3640_s23 + $0x18] sm:$0xff] }
 0x487   : > { %v1568_v21 = vadd.f32 %v2366_v17, %v1567_v20  ;;  %v2075_v17 = vld [vmem:[%s3640_s23 + $0x10] sm:$0xff] }
 0x488   : > { %v1577_v22 = vmax.f32 %v1573_v19, 0.0  ;;  %v2629_v19 = vpack.c.bf16 %v2076_v18, %v2075_v17 }
 0x489   : > { %v1576_v23 = vmax.f32 %v1568_v21, 0.0  ;;  %v2377_v21 = vld [vmem:[#allocation15] ss:$0 sm:$0xff] }
 0x48a   : > { %v1579_v25 = vsel %vm1472_vm5, %v1577_v22, 0.0 }
 0x48b   : > { %v1578_v26 = vsel %vm1472_vm5, %v1576_v23, 0.0 }
 0x48c   : > { %v1580_v27 = vadd.f32 %v1579_v25, %v1578_v26  ;;  %v2378_v26 = vld [vmem:[%s3693_s28] ss:$0 sm:$0xff] }
 0x48e   : > { %v1581_v29 = vrot.slane %v1580_v27, 4 }
 0x490   : > { %v1582_v30 = vadd.f32 %v1581_v29, %v1580_v27 }
 0x492   : > { %v1583_v32 = vrot.slane %v1582_v30, 2 }
 0x494   : > { %v1584_v33 = vadd.f32 %v1583_v32, %v1582_v30  ;;  %v2159_v30 = vstv %s2157_s1 }
 0x496   : > { %v1585_v36 = vrot.slane %v1584_v33, 1 }
 0x498   : > { %v1586_v40 = vadd.f32 %v1585_v36, %v1584_v33 }
 0x49a   : > { %v1587_v45 = vmul.f32 0.0625, %v1586_v40 }
 0x49c   : > { %2515 = vmatmul.mubr.msk.f32.vlgmr.msra.gmra.mrb[10].mxu0 %vm1472_vm5, %v1587_v45  ;;  %2542 = vmatmul.mubr.msk.f32.vlgmr.msra.gmra.mrb[10].mxu1 %vm1472_vm5, %v1587_v45 }
 0x49d   : > { %2603 = vmatpush3.bf16.msra.mxu0 %v2602_v41  ;;  %2615 = vmatpush3.bf16.msra.mxu1 %v2614_v42 }
 0x49e   : > { %2604 = vmatprep.subr.bf16.mxu0 %v3023_v0  ;;  %2616 = vmatprep.subr.bf16.mxu1 %v3023_v0 }
 0x49f   : > { %2525 = vmatprep.mubr.msk.f32.mxu0 %vm3024_vm0, %v3025_v1  ;;  %2552 = vmatprep.mubr.msk.f32.mxu1 %vm3024_vm0, %v3025_v1 }
 0x4a1   : > { %2606 = vmatpush3.bf16.msra.mxu0 %v2605_v49  ;;  %2618 = vmatpush3.bf16.msra.mxu1 %v2617_v50 }
 0x4a2   : > { %2528 = vmatprep.subr.mxu0 %v3025_v1  ;;  %2625 = vmatprep.subr.bf16.mxu1 %v3023_v0 }
 0x4a4   : > { %2526 = vmatmul.mubr.msk.f32.vlgmr.msra.gmra.mrb[10].mxu0 %vm1472_vm5, %v1483_v52  ;;  %2553 = vmatmul.mubr.msk.f32.vlgmr.msra.gmra.mrb[10].mxu1 %vm1472_vm5, %v1587_v45 }
 0x4a5   : > { %2529 = vmatpush3.msk.msra.mxu0 %vm1752_vm6, %v1743_v53  ;;  %2530 = vmatprep.mubr.msk.f32.mxu0 %vm3024_vm0, %v3025_v1 }
 0x4a6   : > { %2619 = vmatprep.subr.bf16.mxu0 %v3023_v0  ;;  %2574 = vmatprep.mubr.msk.f32.mxu1 %vm3024_vm0, %v3025_v1 }
 0x4a7   : > { %2627 = vmatpush3.bf16.msra.mxu1 %v2626_v16 }
 0x4a8   : > { %2531 = vmatmul.mubr.msk.f32.vlgmr.msra.gmra.mrb[12].mxu0 %vm1748_vm7, %v1588_v54  ;;  %2628 = vmatprep.subr.bf16.mxu1 %v3023_v0 }
 0x4a9   : > { %2563 = vmatprep.mubr.msk.f32.mxu0 %vm3024_vm0, %v3025_v1  ;;  %2621 = vmatpush3.bf16.msra.mxu0 %v2620_v58  ;;  %v1986_v1 = vld [vmem:[%s3636_s19 + $0x18] sm:$0xff] }
 0x4aa   : > { %2622 = vmatprep.subr.bf16.mxu0 %v3023_v0  ;;  %v2623_v60 = vpack.c.bf16 %v1986_v1, %v1985_v59  ;;  %v2356_v0 = vld [vmem:[%s3692_s9] ss:$0 sm:$0xff] }
 0x4ab   : > { %2630 = vmatpush3.bf16.msra.mxu1 %v2629_v19  ;;  %v1284_v27 = vadd.f32 %v2356_v0, %v3486_v55 }
 0x4ad   : > { %2624 = vmatpush3.bf16.msra.mxu0 %v2623_v60  ;;  %v2162_v33 = vmul.f32 %v2161_v28, %v1284_v27 }
 0x577   : > { %v1739_v2 = vpop.f32.mrb[10].mxu0  ;;  %v1979_v3 = vpop.f32.mrb[10].mxu1 }
 0x578   : > { %v1990_v4 = vrot.slane %v1979_v3, %v1746_v63  ;;  %v2527_v5 = vpop.f32.mrb[11].mxu0  ;;  %v2554_v6 = vpop.f32.mrb[11].mxu1  ;;  %v1747_v7 = vrot.slane %v1739_v2, %v1746_v63 }
 0x57b   : > { %v1822_v8 = vpop.f32.mrb[12].mxu0 }
 0x57c   : > { %v1823_v10 = vadd.f32 %v1822_v8, %v1747_v7  ;;  %v2532_v11 = vpop.f32.mrb[13].mxu0 }
 0x57e   : > { %v1833_v12 = vadd.f32 %v2373_v9, %v1823_v10 }
 0x580   : > { %v1834_v13 = vmax.f32 %v1833_v12, 0.0 }
 0x582   : > { %2564 = vmatmul.mubr.msk.f32.vlgmr.msra.gmra.mrb[14].mxu0 %vm1472_vm5, %v1834_v13 }
 0x655   : > { %v2060_v20 = vpop.f32.mrb[14].mxu0 }
 0x656   : > { %v2061_v22 = vadd.f32 %v2060_v20, %v1990_v4  ;;  %v2565_v23 = vpop.f32.mrb[15].mxu0 }
 0x658   : > { %v2071_v24 = vadd.f32 %v2377_v21, %v2061_v22 }
 0x65a   : > { %v2072_v25 = vmax.f32 %v2071_v24, 0.0 }
 0x65c   : > { %2575 = vmatmul.mubr.msk.f32.vlgmr.msra.gmra.mrb[12].mxu1 %vm1472_vm5, %v2072_v25 }
 0x72f   : > { %v2153_v29 = vpop.f32.mrb[12].mxu1 }
 0x730   : > { %v2154_v31 = vadd.f32 %v2378_v26, %v2153_v29  ;;  %v2576_v32 = vpop.f32.mrb[13].mxu1 }
 0x732   : > { %v2160_v34 = vmul.f32 %v2159_v30, %v2154_v31 }
 0x734   : > { %v2163_v35 = vadd.f32 %v2162_v33, %v2160_v34 }
 0x736   : > { %2164 = vst.msk [vmem:[%s894_s0] sm:$0xff] %vm1209_vm4, %v2163_v35 }
 0x737 PF: > { %s3695_s8 = sld [smem:[#allocation23_spill]] }
 0x73d   : > { %s41_s29 = sadd.s32 1, %s3695_s8  }
 0x73e   : > { %p38_p10 = scmp.ge.s32.totalorder %s41_s29, 4  }
 0x740   :  { %40 = sbr.rel (!%p38_p10) target bundleno = 20 (0x14), region = 191 }
 0x747   :  { %2184 = vsyncpa [#allocation3], 1 }
 0x748   :  { %2186 = vsyncpa [#allocation3 + $0x1], 1 }
 0x749   :  { %2187 = vsyncpa [#allocation7], 1 }
 0x74a   :  { %2188 = vsyncpa [#allocation10], 1 }
 0x74b   :  { %2189 = vsyncpa [#allocation13], 1 }
 0x74c   :  { %2190 = vsyncpa [#allocation16], 1 }
 0x74d   :  { %2191 = vsyncpa [#allocation4], 1 }
 0x74e   :  { %2193 = vsyncpa [#allocation4 + $0x1], 1 }

</bundles_post_ra>
